<compile_context>
chip_gen: v6e
topology: v6e:2x2x1
jax: 0.10.0
libtpu: 0.0.40
codegen_flags: <defaults>
</compile_context>

<pallas_src>
import functools

import jax
import jax.numpy as jnp
from jax import lax
from jax.experimental import pallas as pl
from jax.experimental.pallas import tpu as pltpu


def _round_up(a, m):
    return -(-a // m) * m


# ---------------- phase 1: global average pool (sum accumulation over HW tiles) -----------

def _pool_kernel(x_ref, sum_ref):
    # x_ref  : (1, thw, C)  current (batch, hw-tile) block, native dtype
    # sum_ref: (1, 1, C)    f32 accumulator, resident across the hw grid axis
    t = pl.program_id(1)

    @pl.when(t == 0)
    def _():
        sum_ref[...] = jnp.zeros_like(sum_ref)

    # f32 accumulation for the reduce only; no f32 copy of the tile is kept live.
    sum_ref[...] += jnp.sum(x_ref[...], axis=1, keepdims=True, dtype=jnp.float32)


# ---------------- phase 2: batched FC (ReLU + sigmoid), M = B matmuls ---------------------

def _fc_kernel(sum_ref, w1_ref, w2_ref, s_ref, *, inv_hw):
    # sum_ref: (B, 1, C) f32 per-channel sums;  w1: (Cr, C);  w2: (C, Cr)
    # s_ref  : (B, 1, C) f32 channel scales
    y = sum_ref[...][:, 0, :] * inv_hw                         # (B, C) true mean
    w1 = w1_ref[...].astype(jnp.float32)
    w2 = w2_ref[...].astype(jnp.float32)
    h = lax.dot_general(y, w1, (((1,), (1,)), ((), ())),
                        preferred_element_type=jnp.float32)     # (B, Cr)
    h = jnp.maximum(h, 0.0)
    s = lax.dot_general(h, w2, (((1,), (1,)), ((), ())),
                        preferred_element_type=jnp.float32)     # (B, C)
    s_ref[...] = jax.nn.sigmoid(s)[:, None, :]


# ---------------- phase 3: channel-wise rescale -------------------------------------------

def _scale_kernel(x_ref, s_ref, o_ref):
    # x_ref: (1, thw, C) native dtype; s_ref: (1, 1, C) f32; o_ref like x_ref
    # Multiply in the input/output dtype; s is cast once per (1,1,C) block.
    o_ref[...] = x_ref[...] * s_ref[...].astype(o_ref.dtype)


def fc_channel_attention(x, w1, w2, *, target_hw_tile=512):
    """x: (B, C, H, W) NCHW; w1: (C//r, C); w2: (C, C//r) — PyTorch nn.Linear weights."""
    B, C, H, W = x.shape
    HW = H * W
    Cr = w1.shape[0]

    # Lane-dense layout: channels on the lane axis.
    xl = jnp.transpose(x, (0, 2, 3, 1)).reshape(B, HW, C)

    # Near-even HW tiling: tile is a multiple of 8 sublanes, minimal zero padding.
    n_hw = max(1, -(-HW // target_hw_tile))
    thw = _round_up(-(-HW // n_hw), 8)
    hw_pad = n_hw * thw
    if hw_pad != HW:
        xl = jnp.pad(xl, ((0, 0), (0, hw_pad - HW), (0, 0)))

    # Explicit VMEM budget: double-buffered input + output blocks plus headroom, capped so it
    # is safe on v7x (64 MiB physical) while still lifting v5e's 16 MiB scoped default.
    blk_bytes = thw * C * xl.dtype.itemsize
    vmem_limit = int(min(48 * 1024 * 1024, max(8 * 1024 * 1024, 8 * blk_bytes)))

    # --- phase 1: per-channel sums (reduction axis last, accumulator output) ---
    sums = pl.pallas_call(
        _pool_kernel,
        out_shape=jax.ShapeDtypeStruct((B, 1, C), jnp.float32),
        grid_spec=pltpu.PrefetchScalarGridSpec(
            num_scalar_prefetch=0,
            grid=(B, n_hw),
            in_specs=[pl.BlockSpec((1, thw, C), lambda b, t: (b, t, 0))],
            out_specs=pl.BlockSpec((1, 1, C), lambda b, t: (b, 0, 0)),
        ),
        compiler_params=pltpu.CompilerParams(
            dimension_semantics=("parallel", "arbitrary"),
            vmem_limit_bytes=vmem_limit,
        ),
    )(xl)

    # --- phase 2: batched FC -> sigmoid channel scales (one M=B matmul pair) ---
    scales = pl.pallas_call(
        functools.partial(_fc_kernel, inv_hw=1.0 / float(HW)),
        out_shape=jax.ShapeDtypeStruct((B, 1, C), jnp.float32),
        grid_spec=pltpu.PrefetchScalarGridSpec(
            num_scalar_prefetch=0,
            grid=(1,),
            in_specs=[
                pl.BlockSpec((B, 1, C), lambda i: (0, 0, 0)),
                pl.BlockSpec((Cr, C), lambda i: (0, 0)),
                pl.BlockSpec((C, Cr), lambda i: (0, 0)),
            ],
            out_specs=pl.BlockSpec((B, 1, C), lambda i: (0, 0, 0)),
        ),
        compiler_params=pltpu.CompilerParams(
            dimension_semantics=("arbitrary",),
        ),
    )(sums, w1, w2)

    # --- phase 3: rescale; both grid axes independent (feeds both TCs on v7x) ---
    out = pl.pallas_call(
        _scale_kernel,
        out_shape=jax.ShapeDtypeStruct((B, hw_pad, C), x.dtype),
        grid_spec=pltpu.PrefetchScalarGridSpec(
            num_scalar_prefetch=0,
            grid=(B, n_hw),
            in_specs=[
                pl.BlockSpec((1, thw, C), lambda b, t: (b, t, 0)),
                pl.BlockSpec((1, 1, C), lambda b, t: (b, 0, 0)),
            ],
            out_specs=pl.BlockSpec((1, thw, C), lambda b, t: (b, t, 0)),
        ),
        compiler_params=pltpu.CompilerParams(
            dimension_semantics=("parallel", "parallel"),
            vmem_limit_bytes=vmem_limit,
        ),
    )(xl, scales)

    out = out[:, :HW, :].reshape(B, H, W, C)
    return jnp.transpose(out, (0, 3, 1, 2))


def fc_channel_attention_ref(x, w1, w2):
    # Pure-JAX reference of the PyTorch forward.
    y = x.mean(axis=(2, 3))                       # (B, C)
    h = jnp.maximum(y @ w1.T, 0.0)                # (B, Cr)
    s = jax.nn.sigmoid(h @ w2.T)                  # (B, C)
    return x * s[:, :, None, None]


if __name__ == "__main__":
    B, C, H, W = 2, 4, 16, 16
    reduction_ratio = 2
    Cr = C // reduction_ratio

    key = jax.random.PRNGKey(0)
    kx, k1, k2 = jax.random.split(key, 3)

    x = jax.random.normal(kx, (B, C, H, W), dtype=jnp.float32)

    # Deterministic synthetic weights (shapes match nn.Linear: (out_features, in_features))
    bound1 = 1.0 / (C ** 0.5)
    bound2 = 1.0 / (Cr ** 0.5)
    w1 = jax.random.uniform(k1, (Cr, C), minval=-bound1, maxval=bound1, dtype=jnp.float32)
    w2 = jax.random.uniform(k2, (C, Cr), minval=-bound2, maxval=bound2, dtype=jnp.float32)

    out = fc_channel_attention(x, w1, w2)
    out = jax.block_until_ready(out)

    ref = fc_channel_attention_ref(x, w1, w2)
    assert out.shape == (B, C, H, W)
    assert jnp.allclose(out, ref, atol=1e-5, rtol=1e-5), "mismatch vs pure-JAX reference"

    print("KERNEL_OK")
</pallas_src>

<mosaic_0001>
module attributes {stable_mosaic.version = 11 : i64} {
  func.func @_pool_kernel(%arg0: i32, %arg1: i32, %arg2: memref<1x256x4xf32, #tpu.memory_space<vmem>>, %arg3: memref<1x1x4xf32, #tpu.memory_space<vmem>>) attributes {dimension_semantics = [#tpu.dimension_semantics<parallel>, #tpu.dimension_semantics<arbitrary>], iteration_bounds = array<i64: 2, 1>, scalar_prefetch = 0 : i64, scratch_operands = 0 : i64, tpu.core_type = #tpu.core_type<tc>, window_params = [{transform_indices = @transform_0, window_bounds = array<i64: 1, 256, 4>}, {transform_indices = @transform_1, window_bounds = array<i64: 1, 1, 4>}]} {
    %c0_i32 = arith.constant 0 : i32
    %0 = arith.cmpi eq, %arg1, %c0_i32 : i32
    %1 = arith.extui %0 : i1 to i32
    %c0_i32_0 = arith.constant 0 : i32
    %2 = arith.cmpi ne, %1, %c0_i32_0 : i32
    scf.if %2 {
      %cst_9 = arith.constant 0.000000e+00 : f32
      %9 = vector.broadcast %cst_9 : f32 to vector<1x1x4xf32>
      %c0_10 = arith.constant 0 : index
      %c0_11 = arith.constant 0 : index
      %c0_12 = arith.constant 0 : index
      %10 = vector.load %arg3[%c0_10, %c0_11, %c0_12] : memref<1x1x4xf32, #tpu.memory_space<vmem>>, vector<1x1x4xf32>
      tpu.vector_store %arg3[%c0_10, %c0_11, %c0_12], %9 {strides = array<i32>} : memref<1x1x4xf32, #tpu.memory_space<vmem>>, vector<1x1x4xf32>,
    } else {
    }
    %c0 = arith.constant 0 : index
    %c0_1 = arith.constant 0 : index
    %c0_2 = arith.constant 0 : index
    %3 = vector.load %arg3[%c0, %c0_1, %c0_2] : memref<1x1x4xf32, #tpu.memory_space<vmem>>, vector<1x1x4xf32>
    %c0_3 = arith.constant 0 : index
    %c0_4 = arith.constant 0 : index
    %c0_5 = arith.constant 0 : index
    %4 = vector.load %arg2[%c0_3, %c0_4, %c0_5] : memref<1x256x4xf32, #tpu.memory_space<vmem>>, vector<1x256x4xf32>
    %cst = arith.constant dense<0.000000e+00> : vector<1x4xf32>
    %5 = vector.multi_reduction <add>, %4, %cst [1] : vector<1x256x4xf32> to vector<1x4xf32>
    %6 = vector.shape_cast %5 : vector<1x4xf32> to vector<1x1x4xf32>
    %7 = arith.addf %3, %6 : vector<1x1x4xf32>
    %c0_6 = arith.constant 0 : index
    %c0_7 = arith.constant 0 : index
    %c0_8 = arith.constant 0 : index
    %8 = vector.load %arg3[%c0_6, %c0_7, %c0_8] : memref<1x1x4xf32, #tpu.memory_space<vmem>>, vector<1x1x4xf32>
    tpu.vector_store %arg3[%c0_6, %c0_7, %c0_8], %7 {strides = array<i32>} : memref<1x1x4xf32, #tpu.memory_space<vmem>>, vector<1x1x4xf32>,
    return
  }
  func.func @transform_0(%arg0: i32, %arg1: i32) -> (i32, i32, i32) {
    %c0_i32 = arith.constant 0 : i32
    %c0_i32_0 = arith.constant 0 : i32
    return %arg0, %arg1, %c0_i32 : i32, i32, i32
  }
  func.func @transform_1(%arg0: i32, %arg1: i32) -> (i32, i32, i32) {
    %c0_i32 = arith.constant 0 : i32
    %c0_i32_0 = arith.constant 0 : i32
    %c0_i32_1 = arith.constant 0 : i32
    return %arg0, %c0_i32, %c0_i32_0 : i32, i32, i32
  }
}

</mosaic_0001>

<bundles_post_ra>
// kernel: tpu_custom_call.1
= control target key start
LH: loop header
LB: loop body
LE: loop exit
PB: predicated region body
PF: predicated region fallthrough
CT: control target
= control target key end

     0   :  { %6 = vsyncpa [#allocation3], 0  ;;  %s670_s0 = inlined_call_operand.vmem [shape: f32[2,256,4], index: 0, kind: input, shape index: {}]   ;;  %s671_s1 = inlined_call_operand.hbm [shape: f32[2,1,4], index: 1, kind: output, shape index: {}]  }
   0x1   :  { %8 = vsyncpa [#allocation3 + $0x1], 0  ;;  %s493_s6 = smov 0   ;;  %s495_s7 = smov 0  }
   0x2   :  { %s497_s8 = smov 0   ;;  %s499_s9 = smov 0  }
   0x3   :  { %s501_s10 = smov 0   ;;  %s503_s11 = smov 0  }
   0x4 LB: > { %s336_s12 = sadd.s32 4294967295, %s479_s11   ;;  %s337_s13 = sadd.s32 4294967294, %s479_s11   ;;  %s479_s11 = sphi %s503_s11, %s14_s11   ;;  %s475_s10 = sphi %s501_s10, %s678_s10   ;;  %s471_s9 = sphi %s499_s9, %s677_s9   ;;  %s467_s8 = sphi %s497_s8, %s676_s8   ;;  %s463_s7 = sphi %s495_s7, %s675_s7   ;;  %s459_s6 = sphi %s493_s6, %s674_s6  }
   0x5   : > { %s26_s14 = sadd.s32 1, %s475_s10  ;;  %s61_s15 = sadd.s32 1, %s467_s8 }
   0x6   : > { %p28_p0 = scmp.ge.s32.totalorder %s26_s14, 2  ;;  %p71_p1 = scmp.ne.s32.totalorder %s467_s8, %s463_s7 }
   0x7   : > { %p72_p2 = scmp.eq.s32.totalorder %s336_s12, 1  ;;  %p77_p3 = scmp.ne.s32.totalorder %s463_s7, %s459_s6 }
   0x8   : > { %s680_s14 = smov (%p28_p0, %s26_s14), 0  ;;  %p78_p5 = scmp.eq.s32.totalorder %s337_s13, 1 }
   0x9   : > { %p533_p4 = por %p72_p2, %p71_p1  ;;  %s58_s17 = ssub.s32 %s475_s10, %s680_s14 }
   0xa   : > { %p340_p6 = scmp.ge.s32.totalorder %s479_s11, 1  ;;  %p59_p7 = scmp.eq.s32.totalorder %s58_s17, 0 }
   0xb   : > { %p540_p8 = por %p78_p5, %p77_p3  ;;  %p109_p9 = scmp.lt.s32.totalorder %s479_s11, 3 }
   0xc   : > { %s546_s19 = scalar_select %p59_p7, %s467_s8, %s61_s15  }
   0xd   : > { %p110_p10 = pnand %p340_p6, %p109_p9 }
   0xe   : > { %s130_s20 = sand.u32 (!%p110_p10), 1, %s463_s7   ;;  %p133_p11 = scmp.lt.s32.totalorder (!%p110_p10), %s471_s9, 1 }
   0xf   : > { %113 = sbr.rel (%p110_p10) target bundleno = 115 (0x73), region = 24  ;;  %s552_s21 = scalar_lea.vmem (!%p110_p10), [#allocation2], %s130_s20 }
  0x10   : > { %s343_s27 = sshll.u32 (!%p110_p10), %s471_s9, 4  ;;  %s267_s28 = sshll.u32 (!%p110_p10), %s552_s21, 4  ;;  %s268_s28 = int_to_ptr.vmem [resolvable:$true] %s267_s28 }
  0x11   : > { %s265_s2 = scalar_lea.hbm (!%p110_p10), %s671_s1, %s343_s27  ;;  %s255_s3 = scalar_lea.sflag (!%p110_p10), [#allocation3], %s130_s20 }
  0x12   : > { %s403_s4 = scalar_lea.vmem (!%p110_p10), %s268_s28, 16  ;;  %s482_s5 = smov (!%p110_p10), [#allocation2]  }
  0x13   : > { %p404_p12 = scmp.ne.s32.totalorder (!%p110_p10), %s268_s28, %s403_s4  ;;  %s407_s12 = sshll.u32 (!%p110_p10), %s482_s5, 4  ;;  %s408_s12 = int_to_ptr.vmem [resolvable:$false] %s407_s12 }
  0x14   : > { %vm146_vm0 = vcmask 24576   ;;  %v481_v0 = vmov 0.0   ;;  %s134_s22 = scalar_select %p133_p11, %s471_s9, 1  ;;  %vm181_vm1 = vcmask 31744  }
  0x15   : > { %147 = vst.msk [vmem:[%s552_s21] sm:$0x1] %vm146_vm0, %v481_v0  ;;  %p405_p13 = pnand %p404_p12, %p533_p4  ;;  %s409_s9 = scalar_lea.vmem %s408_s12, 32 }
  0x16   : > { %s346_s23 = sshll.u32 %s134_s22, 8  ;;  %p410_p1 = scmp.lt.s32.totalorder %s268_s28, %s408_s12 }
  0x17   : > { %s560_s26 = scalar_lea.vmem %s670_s0, %s346_s23  ;;  %p406_p0 = pneg %p405_p13 }
  0x18   : > { %v149_v1 = vld [vmem:[%s560_s26] sm:$0xff]  ;;  %v150_v2 = vld [vmem:[%s560_s26 + $0x8] sm:$0xff]  ;;  %v151_v3 = vld [vmem:[%s560_s26 + $0x10] sm:$0xff]  ;;  %p411_p2 = scmp.lt.s32.totalorder %s409_s9, %s403_s4 }
  0x19   : > { %v152_v4 = vld [vmem:[%s560_s26 + $0x18] sm:$0xff]  ;;  %v182_v5 = vsel %vm181_vm1, %v149_v1, 0.0  ;;  %v183_v6 = vsel %vm181_vm1, %v150_v2, 0.0  ;;  %v185_v7 = vsel %vm181_vm1, %v151_v3, 0.0  ;;  %v153_v8 = vld [vmem:[%s560_s26 + $0x20] sm:$0xff]  ;;  %v154_v11 = vld [vmem:[%s560_s26 + $0x28] sm:$0xff] }
  0x1a   : > { %v184_v9 = vadd.f32 %v183_v6, %v182_v5  ;;  %v187_v10 = vsel %vm181_vm1, %v152_v4, 0.0  ;;  %v189_v13 = vsel %vm181_vm1, %v153_v8, 0.0  ;;  %v155_v14 = vld [vmem:[%s560_s26 + $0x30] sm:$0xff]  ;;  %v191_v16 = vsel %vm181_vm1, %v154_v11, 0.0  ;;  %v156_v17 = vld [vmem:[%s560_s26 + $0x38] sm:$0xff]  ;;  %v157_v20 = vld [vmem:[%s560_s26 + $0x40] sm:$0xff]  ;;  %p412_p3 = por %p411_p2, %p410_p1 }
  0x1b   : > { %v193_v19 = vsel %vm181_vm1, %v155_v14, 0.0  ;;  %v195_v22 = vsel %vm181_vm1, %v156_v17, 0.0  ;;  %v158_v23 = vld [vmem:[%s560_s26 + $0x48] sm:$0xff]  ;;  %v197_v25 = vsel %vm181_vm1, %v157_v20, 0.0  ;;  %v159_v26 = vld [vmem:[%s560_s26 + $0x50] sm:$0xff]  ;;  %v160_v29 = vld [vmem:[%s560_s26 + $0x58] sm:$0xff] }
  0x1c   : > { %v186_v12 = vadd.f32 %v185_v7, %v184_v9  ;;  %v199_v28 = vsel %vm181_vm1, %v158_v23, 0.0  ;;  %v201_v31 = vsel %vm181_vm1, %v159_v26, 0.0  ;;  %v161_v32 = vld [vmem:[%s560_s26 + $0x60] sm:$0xff]  ;;  %v203_v34 = vsel %vm181_vm1, %v160_v29, 0.0  ;;  %v162_v35 = vld [vmem:[%s560_s26 + $0x68] sm:$0xff]  ;;  %v163_v38 = vld [vmem:[%s560_s26 + $0x70] sm:$0xff]  ;;  %p413_p5 = pnand %p412_p3, %p406_p0 }
  0x1d   : > { %v205_v37 = vsel %vm181_vm1, %v161_v32, 0.0  ;;  %v207_v40 = vsel %vm181_vm1, %v162_v35, 0.0  ;;  %v164_v41 = vld [vmem:[%s560_s26 + $0x78] sm:$0xff]  ;;  %v209_v43 = vsel %vm181_vm1, %v163_v38, 0.0  ;;  %v165_v44 = vld [vmem:[%s560_s26 + $0x80] sm:$0xff]  ;;  %v166_v47 = vld [vmem:[%s560_s26 + $0x88] sm:$0xff] }
  0x1e   : > { %v188_v15 = vadd.f32 %v187_v10, %v186_v12  ;;  %v211_v46 = vsel %vm181_vm1, %v164_v41, 0.0  ;;  %v213_v49 = vsel %vm181_vm1, %v165_v44, 0.0  ;;  %v167_v50 = vld [vmem:[%s560_s26 + $0x90] sm:$0xff]  ;;  %v215_v52 = vsel %vm181_vm1, %v166_v47, 0.0  ;;  %v168_v53 = vld [vmem:[%s560_s26 + $0x98] sm:$0xff]  ;;  %v169_v56 = vld [vmem:[%s560_s26 + $0xa0] sm:$0xff] }
  0x1f   : > { %v217_v55 = vsel %vm181_vm1, %v167_v50, 0.0  ;;  %v219_v58 = vsel %vm181_vm1, %v168_v53, 0.0  ;;  %v170_v59 = vld [vmem:[%s560_s26 + $0xa8] sm:$0xff]  ;;  %v221_v61 = vsel %vm181_vm1, %v169_v56, 0.0  ;;  %v171_v62 = vld [vmem:[%s560_s26 + $0xb0] sm:$0xff]  ;;  %v172_v1 = vld [vmem:[%s560_s26 + $0xb8] sm:$0xff] }
  0x20   : > { %v190_v18 = vadd.f32 %v189_v13, %v188_v15  ;;  %v223_v0 = vsel %vm181_vm1, %v170_v59, 0.0  ;;  %v225_v3 = vsel %vm181_vm1, %v171_v62, 0.0  ;;  %v173_v4 = vld [vmem:[%s560_s26 + $0xc0] sm:$0xff]  ;;  %v227_v6 = vsel %vm181_vm1, %v172_v1, 0.0  ;;  %v174_v7 = vld [vmem:[%s560_s26 + $0xc8] sm:$0xff]  ;;  %v175_v10 = vld [vmem:[%s560_s26 + $0xd0] sm:$0xff] }
  0x21   : > { %v229_v9 = vsel %vm181_vm1, %v173_v4, 0.0  ;;  %v231_v12 = vsel %vm181_vm1, %v174_v7, 0.0  ;;  %v176_v13 = vld [vmem:[%s560_s26 + $0xd8] sm:$0xff]  ;;  %v233_v15 = vsel %vm181_vm1, %v175_v10, 0.0 }
  0x22   : > { %v192_v21 = vadd.f32 %v191_v16, %v190_v18  ;;  %v177_v16 = vld [vmem:[%s560_s26 + $0xe0] sm:$0xff]  ;;  %v235_v18 = vsel %vm181_vm1, %v176_v13, 0.0 }
  0x24   : > { %v194_v24 = vadd.f32 %v193_v19, %v192_v21  ;;  %v178_v19 = vld [vmem:[%s560_s26 + $0xe8] sm:$0xff]  ;;  %v237_v21 = vsel %vm181_vm1, %v177_v16, 0.0 }
  0x26   : > { %v196_v27 = vadd.f32 %v195_v22, %v194_v24  ;;  %v179_v22 = vld [vmem:[%s560_s26 + $0xf0] sm:$0xff]  ;;  %v239_v24 = vsel %vm181_vm1, %v178_v19, 0.0 }
  0x28   : > { %v198_v30 = vadd.f32 %v197_v25, %v196_v27  ;;  %v180_v25 = vld [vmem:[%s560_s26 + $0xf8] sm:$0xff]  ;;  %v241_v27 = vsel %vm181_vm1, %v179_v22, 0.0 }
  0x29   : > { %v243_v29 = vsel %vm181_vm1, %v180_v25, 0.0 }
  0x2a   : > { %v200_v33 = vadd.f32 %v199_v28, %v198_v30 }
  0x2c   : > { %v202_v36 = vadd.f32 %v201_v31, %v200_v33 }
  0x2e   : > { %v204_v39 = vadd.f32 %v203_v34, %v202_v36 }
  0x30   : > { %v206_v42 = vadd.f32 %v205_v37, %v204_v39  ;;  %v148_v37 = vld [vmem:[%s552_s21] sm:$0x1] }
  0x32   : > { %v208_v45 = vadd.f32 %v207_v40, %v206_v42 }
  0x34   : > { %v210_v48 = vadd.f32 %v209_v43, %v208_v45 }
  0x36   : > { %v212_v51 = vadd.f32 %v211_v46, %v210_v48 }
  0x38   : > { %v214_v54 = vadd.f32 %v213_v49, %v212_v51 }
  0x3a   : > { %v216_v57 = vadd.f32 %v215_v52, %v214_v54 }
  0x3c   : > { %v218_v60 = vadd.f32 %v217_v55, %v216_v57 }
  0x3e   : > { %v220_v63 = vadd.f32 %v219_v58, %v218_v60 }
  0x40   : > { %v222_v2 = vadd.f32 %v221_v61, %v220_v63 }
  0x42   : > { %v224_v5 = vadd.f32 %v223_v0, %v222_v2 }
  0x44   : > { %v226_v8 = vadd.f32 %v225_v3, %v224_v5 }
  0x46   : > { %v228_v11 = vadd.f32 %v227_v6, %v226_v8 }
  0x48   : > { %v230_v14 = vadd.f32 %v229_v9, %v228_v11 }
  0x4a   : > { %v232_v17 = vadd.f32 %v231_v12, %v230_v14 }
  0x4c   : > { %v234_v20 = vadd.f32 %v233_v15, %v232_v17 }
  0x4e   : > { %v236_v23 = vadd.f32 %v235_v18, %v234_v20 }
  0x50   : > { %v238_v26 = vadd.f32 %v237_v21, %v236_v23 }
  0x52   : > { %v240_v28 = vadd.f32 %v239_v24, %v238_v26 }
  0x54   : > { %v242_v30 = vadd.f32 %v241_v27, %v240_v28 }
  0x56   : > { %v244_v31 = vadd.f32 %v243_v29, %v242_v30 }
  0x58   : > { %v245_v32 = vrot.slane %v244_v31, 4 }
  0x5a   : > { %v246_v33 = vadd.f32 %v245_v32, %v244_v31 }
  0x5c   : > { %v247_v34 = vrot.slane %v246_v33, 2 }
  0x5e   : > { %v248_v35 = vadd.f32 %v247_v34, %v246_v33 }
  0x60   : > { %v249_v36 = vrot.slane %v248_v35, 1 }
  0x62   : > { %v250_v38 = vadd.f32 %v249_v36, %v248_v35 }
  0x64   : > { %v251_v39 = vadd.f32 %v250_v38, %v148_v37 }
  0x66   : > { %253 = vst.msk [vmem:[%s552_s21] sm:$0x1] %vm146_vm0, %v251_v39 }
  0x67   : > { %416 = shalt.err (!%p413_p5)
}
  0x68   : > { %s417_s13 = scalar_lea.hbm %s265_s2, 16  ;;  %s421_s20 = scalar_lea.hbm %s671_s1, 32 }
  0x69   : > { %p418_p6 = scmp.ne.s32.totalorder %s265_s2, %s417_s13  ;;  %p422_p10 = scmp.lt.s32.totalorder %s265_s2, %s671_s1 }
  0x6a   : > { %p423_p11 = scmp.lt.s32.totalorder %s421_s20, %s417_s13 }
  0x6b   : > { %p419_p7 = pnand %p418_p6, %p533_p4 }
  0x6c   : > { %p424_p12 = por %p423_p11, %p422_p10 }
  0x6d   : > { %p420_p9 = pneg %p419_p7 }
  0x6f   : > { %p425_p13 = pnand %p424_p12, %p420_p9 }
  0x71   : > { %428 = shalt.err (!%p425_p13)
}
  0x72   : > { %347 = dma.vmem_to_hbm [thread:$0]  (%p533_p4), %s268_s28, 16, %s265_s2, %s255_s3  }
  0x73 PF: > { %p353_p0 = scmp.ge.s32.totalorder %s479_s11, 2  ;;  %s279_s23 = sand.u32 1, %s459_s6  }
  0x74   : > { %s280_s24 = scalar_lea.sflag [#allocation3], %s279_s23 }
  0x75   : > { %p350_p1 = pnand %p353_p0, %p540_p8 }
  0x77   : > { %p351_p2 = pneg %p350_p1 }
  0x79   : > { %454 = dma.done.wait (%p351_p2), %s280_s24, 16  }
  0x7a   : > { %456 = vsyncadd (%p351_p2), %s280_s24, 4294967280  ;;  %s14_s11 = sadd.s32 1, %s479_s11   ;;  %s674_s6 = smov %s463_s7 }
  0x7b   : > { %p11_p3 = scmp.ge.s32.totalorder %s14_s11, 4   ;;  %s675_s7 = smov %s467_s8 }
  0x7c   : > { %s676_s8 = smov %s546_s19  ;;  %s677_s9 = smov %s475_s10 }
  0x7d   : > { %s678_s10 = smov %s680_s14  ;;  %13 = sbr.rel (!%p11_p3) target bundleno = 4 (0x4), region = 63 }
  0x82   :  { %284 = vsyncpa [#allocation3], 1 }
  0x83   :  { %286 = vsyncpa [#allocation3 + $0x1], 1 }

</bundles_post_ra>
